<compile_context>
chip_gen: v7x
topology: tpu7x:2x2x1
jax: 0.10.0
libtpu: 0.0.40
codegen_flags: <defaults>
</compile_context>

<pallas_src>
import jax
import jax.numpy as jnp
from jax.experimental import pallas as pl
from jax.experimental.pallas import tpu as pltpu


def operator_g_kernel(x_ref, w1_ref, b1_ref, w2_ref, b2_ref, w3_ref, b3_ref, o_ref):
    x = x_ref[...]
    h1 = jnp.maximum(
        jnp.dot(x, w1_ref[...], preferred_element_type=jnp.float32) + b1_ref[...], 0.0)
    h2 = jnp.maximum(
        jnp.dot(h1, w2_ref[...], preferred_element_type=jnp.float32) + b2_ref[...], 0.0)
    out = jnp.dot(h2, w3_ref[...], preferred_element_type=jnp.float32) + b3_ref[...]
    o_ref[...] = out.astype(o_ref.dtype)


def _round_up(n, m):
    return ((n + m - 1) // m) * m


def operator_g_forward(x, params, *, tile_b=512):
    """x: (B, h_dim) -> (B, data_dim). Whole 3-layer MLP fused in one kernel."""
    w1, b1, w2, b2, w3, b3 = params
    B, h_dim = x.shape
    hidden = w1.shape[1]          # 128
    data_dim = w3.shape[1]

    # Lane-dense output: pad output feature dim to a multiple of 128 (zero columns).
    d_pad = _round_up(max(data_dim, 128), 128)
    if d_pad != data_dim:
        w3 = jnp.pad(w3, ((0, 0), (0, d_pad - data_dim)))
        b3 = jnp.pad(b3, ((0, 0), (0, d_pad - data_dim)))

    # Batch tiling: pad B up to a multiple of 8 (sublane), pick tile, pad to tile multiple.
    b8 = _round_up(B, 8)
    tb = min(tile_b, b8)
    b_pad = _round_up(b8, tb)
    if b_pad != B:
        x = jnp.pad(x, ((0, b_pad - B), (0, 0)))
    grid = (b_pad // tb,)

    out = pl.pallas_call(
        operator_g_kernel,
        out_shape=jax.ShapeDtypeStruct((b_pad, d_pad), jnp.float32),
        grid_spec=pltpu.PrefetchScalarGridSpec(
            num_scalar_prefetch=0,
            grid=grid,
            in_specs=[
                pl.BlockSpec((tb, h_dim), lambda i: (i, 0)),       # x tile
                pl.BlockSpec((h_dim, hidden), lambda i: (0, 0)),   # w1 (VMEM-resident)
                pl.BlockSpec((1, hidden), lambda i: (0, 0)),       # b1
                pl.BlockSpec((hidden, hidden), lambda i: (0, 0)),  # w2
                pl.BlockSpec((1, hidden), lambda i: (0, 0)),       # b2
                pl.BlockSpec((hidden, d_pad), lambda i: (0, 0)),   # w3 (lane-padded)
                pl.BlockSpec((1, d_pad), lambda i: (0, 0)),        # b3 (lane-padded)
            ],
            out_specs=pl.BlockSpec((tb, d_pad), lambda i: (i, 0)),
        ),
        compiler_params=pltpu.CompilerParams(
            dimension_semantics=("parallel",),
            vmem_limit_bytes=64 * 1024 * 1024,
        ),
    )(x, w1, b1, w2, b2, w3, b3)

    return out[:B, :data_dim]


def init_operator_g_params(key, h_dim, data_dim):
    """Deterministic synthetic parameters (PyTorch-style uniform(-1/sqrt(fan_in)))."""
    def linear(key, fan_in, fan_out):
        kw, kb = jax.random.split(key)
        bound = 1.0 / jnp.sqrt(fan_in)
        w = jax.random.uniform(kw, (fan_in, fan_out), jnp.float32, -bound, bound)
        b = jax.random.uniform(kb, (1, fan_out), jnp.float32, -bound, bound)
        return w, b

    keys = jax.random.split(key, 3)
    w1, b1 = linear(keys[0], h_dim, 128)
    w2, b2 = linear(keys[1], 128, 128)
    w3, b3 = linear(keys[2], 128, data_dim)
    return (w1, b1, w2, b2, w3, b3)


def operator_g_reference(x, params):
    w1, b1, w2, b2, w3, b3 = params
    h1 = jnp.maximum(x @ w1 + b1, 0.0)
    h2 = jnp.maximum(h1 @ w2 + b2, 0.0)
    return h2 @ w3 + b3


if __name__ == "__main__":
    B = 8
    h_dim = 32
    data_dim = 32

    key = jax.random.PRNGKey(0)
    k_params, k_x = jax.random.split(key)

    params = init_operator_g_params(k_params, h_dim, data_dim)
    x = jax.random.normal(k_x, (B, h_dim), jnp.float32)

    out = operator_g_forward(x, params)
    jax.block_until_ready(out)

    ref = operator_g_reference(x, params)
    assert out.shape == (B, data_dim)
    assert jnp.allclose(out, ref, atol=1e-5, rtol=1e-5)

    print("KERNEL_OK")
</pallas_src>

<mosaic_0001>
module attributes {stable_mosaic.version = 11 : i64} {
  func.func @operator_g_kernel(%arg0: i32, %arg1: memref<8x32xf32, #tpu.memory_space<vmem>>, %arg2: memref<32x128xf32, #tpu.memory_space<vmem>>, %arg3: memref<1x128xf32, #tpu.memory_space<vmem>>, %arg4: memref<128x128xf32, #tpu.memory_space<vmem>>, %arg5: memref<1x128xf32, #tpu.memory_space<vmem>>, %arg6: memref<128x128xf32, #tpu.memory_space<vmem>>, %arg7: memref<1x128xf32, #tpu.memory_space<vmem>>, %arg8: memref<8x128xf32, #tpu.memory_space<vmem>>) attributes {dimension_semantics = [#tpu.dimension_semantics<parallel>], iteration_bounds = array<i64: 1>, scalar_prefetch = 0 : i64, scratch_operands = 0 : i64, tpu.core_type = #tpu.core_type<tc>, window_params = [{transform_indices = @transform_0, window_bounds = array<i64: 8, 32>}, {pipeline_mode = #tpu.pipeline_mode<synchronous>, transform_indices = @transform_1, window_bounds = array<i64: 32, 128>}, {pipeline_mode = #tpu.pipeline_mode<synchronous>, transform_indices = @transform_2, window_bounds = array<i64: 1, 128>}, {pipeline_mode = #tpu.pipeline_mode<synchronous>, transform_indices = @transform_3, window_bounds = array<i64: 128, 128>}, {pipeline_mode = #tpu.pipeline_mode<synchronous>, transform_indices = @transform_4, window_bounds = array<i64: 1, 128>}, {pipeline_mode = #tpu.pipeline_mode<synchronous>, transform_indices = @transform_5, window_bounds = array<i64: 128, 128>}, {pipeline_mode = #tpu.pipeline_mode<synchronous>, transform_indices = @transform_6, window_bounds = array<i64: 1, 128>}, {transform_indices = @transform_7, window_bounds = array<i64: 8, 128>}]} {
    %c0 = arith.constant 0 : index
    %c0_0 = arith.constant 0 : index
    %0 = vector.load %arg1[%c0, %c0_0] : memref<8x32xf32, #tpu.memory_space<vmem>>, vector<8x32xf32>
    %c0_1 = arith.constant 0 : index
    %c0_2 = arith.constant 0 : index
    %1 = vector.load %arg2[%c0_1, %c0_2] : memref<32x128xf32, #tpu.memory_space<vmem>>, vector<32x128xf32>
    %cst = arith.constant dense<0.000000e+00> : vector<8x128xf32>
    %2 = tpu.matmul %0, %1, %cst {dimension_numbers = #tpu.dot_dimension_numbers<[1], [0], [0], [1], [0, 0, 1, 1], [], []>} : vector<8x32xf32>, vector<32x128xf32>, vector<8x128xf32> -> vector<8x128xf32>
    %c0_3 = arith.constant 0 : index
    %c0_4 = arith.constant 0 : index
    %3 = vector.load %arg3[%c0_3, %c0_4] : memref<1x128xf32, #tpu.memory_space<vmem>>, vector<1x128xf32>
    %4 = vector.broadcast %3 : vector<1x128xf32> to vector<8x128xf32>
    %5 = arith.addf %2, %4 : vector<8x128xf32>
    %cst_5 = arith.constant 0.000000e+00 : f32
    %6 = vector.broadcast %cst_5 : f32 to vector<8x128xf32>
    %7 = arith.maximumf %5, %6 : vector<8x128xf32>
    %c0_6 = arith.constant 0 : index
    %c0_7 = arith.constant 0 : index
    %8 = vector.load %arg4[%c0_6, %c0_7] : memref<128x128xf32, #tpu.memory_space<vmem>>, vector<128x128xf32>
    %cst_8 = arith.constant dense<0.000000e+00> : vector<8x128xf32>
    %9 = tpu.matmul %7, %8, %cst_8 {dimension_numbers = #tpu.dot_dimension_numbers<[1], [0], [0], [1], [0, 0, 1, 1], [], []>} : vector<8x128xf32>, vector<128x128xf32>, vector<8x128xf32> -> vector<8x128xf32>
    %c0_9 = arith.constant 0 : index
    %c0_10 = arith.constant 0 : index
    %10 = vector.load %arg5[%c0_9, %c0_10] : memref<1x128xf32, #tpu.memory_space<vmem>>, vector<1x128xf32>
    %11 = vector.broadcast %10 : vector<1x128xf32> to vector<8x128xf32>
    %12 = arith.addf %9, %11 : vector<8x128xf32>
    %cst_11 = arith.constant 0.000000e+00 : f32
    %13 = vector.broadcast %cst_11 : f32 to vector<8x128xf32>
    %14 = arith.maximumf %12, %13 : vector<8x128xf32>
    %c0_12 = arith.constant 0 : index
    %c0_13 = arith.constant 0 : index
    %15 = vector.load %arg6[%c0_12, %c0_13] : memref<128x128xf32, #tpu.memory_space<vmem>>, vector<128x128xf32>
    %cst_14 = arith.constant dense<0.000000e+00> : vector<8x128xf32>
    %16 = tpu.matmul %14, %15, %cst_14 {dimension_numbers = #tpu.dot_dimension_numbers<[1], [0], [0], [1], [0, 0, 1, 1], [], []>} : vector<8x128xf32>, vector<128x128xf32>, vector<8x128xf32> -> vector<8x128xf32>
    %c0_15 = arith.constant 0 : index
    %c0_16 = arith.constant 0 : index
    %17 = vector.load %arg7[%c0_15, %c0_16] : memref<1x128xf32, #tpu.memory_space<vmem>>, vector<1x128xf32>
    %18 = vector.broadcast %17 : vector<1x128xf32> to vector<8x128xf32>
    %19 = arith.addf %16, %18 : vector<8x128xf32>
    %c0_17 = arith.constant 0 : index
    %c0_18 = arith.constant 0 : index
    %20 = vector.load %arg8[%c0_17, %c0_18] : memref<8x128xf32, #tpu.memory_space<vmem>>, vector<8x128xf32>
    tpu.vector_store %arg8[%c0_17, %c0_18], %19 {strides = array<i32>} : memref<8x128xf32, #tpu.memory_space<vmem>>, vector<8x128xf32>,
    return
  }
  func.func @transform_0(%arg0: i32) -> (i32, i32) {
    %c0_i32 = arith.constant 0 : i32
    %c0_i32_0 = arith.constant 0 : i32
    return %arg0, %c0_i32 : i32, i32
  }
  func.func @transform_1(%arg0: i32) -> (i32, i32) {
    %c0_i32 = arith.constant 0 : i32
    %c0_i32_0 = arith.constant 0 : i32
    %c0_i32_1 = arith.constant 0 : i32
    return %c0_i32, %c0_i32_0 : i32, i32
  }
  func.func @transform_2(%arg0: i32) -> (i32, i32) {
    %c0_i32 = arith.constant 0 : i32
    %c0_i32_0 = arith.constant 0 : i32
    %c0_i32_1 = arith.constant 0 : i32
    return %c0_i32, %c0_i32_0 : i32, i32
  }
  func.func @transform_3(%arg0: i32) -> (i32, i32) {
    %c0_i32 = arith.constant 0 : i32
    %c0_i32_0 = arith.constant 0 : i32
    %c0_i32_1 = arith.constant 0 : i32
    return %c0_i32, %c0_i32_0 : i32, i32
  }
  func.func @transform_4(%arg0: i32) -> (i32, i32) {
    %c0_i32 = arith.constant 0 : i32
    %c0_i32_0 = arith.constant 0 : i32
    %c0_i32_1 = arith.constant 0 : i32
    return %c0_i32, %c0_i32_0 : i32, i32
  }
  func.func @transform_5(%arg0: i32) -> (i32, i32) {
    %c0_i32 = arith.constant 0 : i32
    %c0_i32_0 = arith.constant 0 : i32
    %c0_i32_1 = arith.constant 0 : i32
    return %c0_i32, %c0_i32_0 : i32, i32
  }
  func.func @transform_6(%arg0: i32) -> (i32, i32) {
    %c0_i32 = arith.constant 0 : i32
    %c0_i32_0 = arith.constant 0 : i32
    %c0_i32_1 = arith.constant 0 : i32
    return %c0_i32, %c0_i32_0 : i32, i32
  }
  func.func @transform_7(%arg0: i32) -> (i32, i32) {
    %c0_i32 = arith.constant 0 : i32
    %c0_i32_0 = arith.constant 0 : i32
    return %arg0, %c0_i32 : i32, i32
  }
}

</mosaic_0001>

<bundles_post_ra>
// kernel: tpu_custom_call.1
= control target key start
LH: loop header
LB: loop body
LE: loop exit
PB: predicated region body
PF: predicated region fallthrough
CT: control target
= control target key end

     0   :  { %12 = vsyncpa [#allocation3], 0  ;;  %s963_s0 = inlined_call_operand.hbm [shape: f32[8,32], index: 0, kind: input, shape index: {}]   ;;  %s964_s1 = inlined_call_operand.hbm [shape: f32[32,128], index: 1, kind: input, shape index: {}]   ;;  %s965_s2 = inlined_call_operand.hbm [shape: f32[1,128], index: 2, kind: input, shape index: {}]   ;;  %s966_s3 = inlined_call_operand.hbm [shape: f32[128,128], index: 3, kind: input, shape index: {}]   ;;  %s967_s4 = inlined_call_operand.hbm [shape: f32[1,128], index: 4, kind: input, shape index: {}]   ;;  %s968_s5 = inlined_call_operand.hbm [shape: f32[128,128], index: 5, kind: input, shape index: {}]   ;;  %s969_s6 = inlined_call_operand.hbm [shape: f32[1,128], index: 6, kind: input, shape index: {}]   ;;  %s970_s7 = inlined_call_operand.hbm [shape: f32[8,128], index: 7, kind: output, shape index: {}]  }
   0x1   :  { %13 = vsyncpa [#allocation6], 0 }
   0x2   :  { %14 = vsyncpa [#allocation9], 0 }
   0x3   :  { %15 = vsyncpa [#allocation12], 0 }
   0x4   :  { %16 = vsyncpa [#allocation4], 0  ;;  %s784_s24 = smov [#allocation5]   ;;  %s598_s28 = scalar_lea.hbm %s964_s1, 512 }
   0x5   :  { %s32_s25 = sshll.u32 %s784_s24, 4  ;;  %p599_p0 = scmp.ne.s32.totalorder %s964_s1, %s598_s28  ;;  %s33_s25 = int_to_ptr.vmem [resolvable:$true] %s32_s25 }
   0x6   :  { %p602_p1 = scmp.lt.u32.totalorder %s598_s28, %s964_s1 }
   0x8   :  { %p604_p2 = pnand %p602_p1, %p599_p0 }
   0xa   :  { %607 = shalt.err (!%p604_p2)
}
   0xb   :  { %s608_s10 = scalar_lea.vmem %s33_s25, 512  ;;  %p613_p4 = scmp.lt.s32.totalorder %s33_s25, %s33_s25 }
   0xc   :  { %p609_p3 = scmp.ne.s32.totalorder %s33_s25, %s608_s10  ;;  %p614_p5 = scmp.lt.s32.totalorder %s608_s10, %s608_s10 }
   0xe   :  { %p615_p6 = por %p614_p5, %p613_p4 }
  0x10   :  { %p616_p7 = pnand %p615_p6, %p609_p3 }
  0x12   :  { %619 = shalt.err (!%p616_p7)
}
  0x13   :  { %s785_s11 = smov 128   ;;  %s786_s12 = smov 8  }
  0x14   :  { %38 = dma.hbm_to_vmem [thread:$0]  %s964_s1, 512, %s33_s25, [#allocation6], %s785_s11, %s785_s11, %s786_s12  }
  0x15   :  { %s787_s15 = smov [#allocation8]   ;;  %s788_s17 = smov [#allocation11]  }
  0x16   :  { %s54_s16 = sshll.u32 %s787_s15, 4  ;;  %s76_s18 = sshll.u32 %s788_s17, 4  ;;  %s55_s16 = int_to_ptr.vmem [resolvable:$true] %s54_s16  ;;  %s77_s18 = int_to_ptr.vmem [resolvable:$true] %s76_s18 }
  0x17   :  { %s620_s21 = scalar_lea.hbm %s966_s3, 2048 }
  0x18   :  { %p621_p8 = scmp.ne.s32.totalorder %s966_s3, %s620_s21  ;;  %p624_p9 = scmp.lt.u32.totalorder %s620_s21, %s966_s3 }
  0x1a   :  { %p626_p10 = pnand %p624_p9, %p621_p8 }
  0x1c   :  { %629 = shalt.err (!%p626_p10)
}
  0x1d   :  { %s630_s1 = scalar_lea.vmem %s55_s16, 2048  ;;  %p635_p12 = scmp.lt.s32.totalorder %s55_s16, %s55_s16 }
  0x1e   :  { %p631_p11 = scmp.ne.s32.totalorder %s55_s16, %s630_s1  ;;  %p636_p13 = scmp.lt.s32.totalorder %s630_s1, %s630_s1 }
  0x20   :  { %p637_p0 = por %p636_p13, %p635_p12 }
  0x22   :  { %p638_p1 = pnand %p637_p0, %p631_p11 }
  0x24   :  { %641 = shalt.err (!%p638_p1)
}
  0x25   :  { %60 = dma.hbm_to_vmem [thread:$0]  %s966_s3, 2048, %s55_s16, [#allocation9], %s785_s11, %s785_s11, %s786_s12  }
  0x26   :  { %s642_s30 = scalar_lea.hbm %s968_s5, 2048 }
  0x27   :  { %p643_p2 = scmp.ne.s32.totalorder %s968_s5, %s642_s30  ;;  %p646_p3 = scmp.lt.u32.totalorder %s642_s30, %s968_s5 }
  0x29   :  { %p648_p4 = pnand %p646_p3, %p643_p2 }
  0x2b   :  { %651 = shalt.err (!%p648_p4)
}
  0x2c   :  { %s652_s14 = scalar_lea.vmem %s77_s18, 2048  ;;  %p657_p6 = scmp.lt.s32.totalorder %s77_s18, %s77_s18 }
  0x2d   :  { %p653_p5 = scmp.ne.s32.totalorder %s77_s18, %s652_s14  ;;  %p658_p7 = scmp.lt.s32.totalorder %s652_s14, %s652_s14 }
  0x2f   :  { %p659_p8 = por %p658_p7, %p657_p6 }
  0x31   :  { %p660_p9 = pnand %p659_p8, %p653_p5 }
  0x33   :  { %663 = shalt.err (!%p660_p9)
}
  0x34   :  { %82 = dma.hbm_to_vmem [thread:$0]  %s968_s5, 2048, %s77_s18, [#allocation12], %s785_s11, %s785_s11, %s786_s12  }
  0x35   :  { %s789_s16 = smov [#allocation2]   ;;  %s790_s19 = smov [#allocation7]  }
  0x36   :  { %s23_s17 = sshll.u32 %s789_s16, 4  ;;  %s45_s20 = sshll.u32 %s790_s19, 4  ;;  %s24_s17 = int_to_ptr.vmem [resolvable:$true] %s23_s17  ;;  %s46_s20 = int_to_ptr.vmem [resolvable:$true] %s45_s20 }
  0x37   :  { %s664_s23 = scalar_lea.hbm %s963_s0, 128 }
  0x38   :  { %p665_p10 = scmp.ne.s32.totalorder %s963_s0, %s664_s23  ;;  %p668_p11 = scmp.lt.u32.totalorder %s664_s23, %s963_s0 }
  0x3a   :  { %p670_p12 = pnand %p668_p11, %p665_p10 }
  0x3c   :  { %673 = shalt.err (!%p670_p12)
}
  0x3d   :  { %s674_s5 = scalar_lea.vmem %s24_s17, 128  ;;  %p679_p0 = scmp.lt.s32.totalorder %s24_s17, %s24_s17 }
  0x3e   :  { %p675_p13 = scmp.ne.s32.totalorder %s24_s17, %s674_s5  ;;  %p680_p1 = scmp.lt.s32.totalorder %s674_s5, %s674_s5 }
  0x40   :  { %p681_p2 = por %p680_p1, %p679_p0 }
  0x42   :  { %p682_p3 = pnand %p681_p2, %p675_p13 }
  0x44   :  { %685 = shalt.err (!%p682_p3)
}
  0x45   :  { %26 = dma.hbm_to_vmem [thread:$0]  %s963_s0, 128, %s24_s17, [#allocation3]  }
  0x46   :  { %s686_s28 = scalar_lea.hbm %s965_s2, 16 }
  0x47   :  { %p687_p4 = scmp.ne.s32.totalorder %s965_s2, %s686_s28  ;;  %p690_p5 = scmp.lt.u32.totalorder %s686_s28, %s965_s2 }
  0x49   :  { %p692_p6 = pnand %p690_p5, %p687_p4 }
  0x4b   :  { %695 = shalt.err (!%p692_p6)
}
  0x4c   :  { %s696_s10 = scalar_lea.vmem %s46_s20, 16  ;;  %s700_s13 = scalar_lea.vmem %s46_s20, 32 }
  0x4d   :  { %p697_p7 = scmp.ne.s32.totalorder %s46_s20, %s696_s10  ;;  %p701_p8 = scmp.lt.s32.totalorder %s46_s20, %s46_s20 }
  0x4e   :  { %p702_p9 = scmp.lt.s32.totalorder %s700_s13, %s696_s10 }
  0x50   :  { %p703_p10 = por %p702_p9, %p701_p8 }
  0x52   :  { %p704_p11 = pnand %p703_p10, %p697_p7 }
  0x54   :  { %707 = shalt.err (!%p704_p11)
}
  0x55   :  { %48 = dma.hbm_to_vmem [thread:$0]  %s965_s2, 16, %s46_s20, [#allocation6]  }
  0x56   :  { %s791_s3 = smov [#allocation10]   ;;  %s792_s16 = smov [#allocation13]  }
  0x57   :  { %s67_s15 = sshll.u32 %s791_s3, 4  ;;  %s89_s17 = sshll.u32 %s792_s16, 4  ;;  %s68_s15 = int_to_ptr.vmem [resolvable:$true] %s67_s15  ;;  %s90_s17 = int_to_ptr.vmem [resolvable:$true] %s89_s17 }
  0x58   :  { %s708_s22 = scalar_lea.hbm %s967_s4, 16 }
  0x59   :  { %p709_p12 = scmp.ne.s32.totalorder %s967_s4, %s708_s22  ;;  %p712_p13 = scmp.lt.u32.totalorder %s708_s22, %s967_s4 }
  0x5b   :  { %p714_p0 = pnand %p712_p13, %p709_p12 }
  0x5d   :  { %717 = shalt.err (!%p714_p0)
}
  0x5e   :  { %s718_s2 = scalar_lea.vmem %s68_s15, 16  ;;  %s722_s20 = scalar_lea.vmem %s68_s15, 32 }
  0x5f   :  { %p719_p1 = scmp.ne.s32.totalorder %s68_s15, %s718_s2  ;;  %p723_p2 = scmp.lt.s32.totalorder %s68_s15, %s68_s15 }
  0x60   :  { %p724_p3 = scmp.lt.s32.totalorder %s722_s20, %s718_s2 }
  0x62   :  { %p725_p4 = por %p724_p3, %p723_p2 }
  0x64   :  { %p726_p5 = pnand %p725_p4, %p719_p1 }
  0x66   :  { %729 = shalt.err (!%p726_p5)
}
  0x67   :  { %70 = dma.hbm_to_vmem [thread:$0]  %s967_s4, 16, %s68_s15, [#allocation9]  }
  0x68   :  { %s730_s18 = scalar_lea.hbm %s969_s6, 16 }
  0x69   :  { %p731_p6 = scmp.ne.s32.totalorder %s969_s6, %s730_s18  ;;  %p734_p7 = scmp.lt.u32.totalorder %s730_s18, %s969_s6 }
  0x6b   :  { %p736_p8 = pnand %p734_p7, %p731_p6 }
  0x6d   :  { %739 = shalt.err (!%p736_p8)
}
  0x6e   :  { %s740_s8 = scalar_lea.vmem %s90_s17, 16  ;;  %s744_s9 = scalar_lea.vmem %s90_s17, 32 }
  0x6f   :  { %p741_p9 = scmp.ne.s32.totalorder %s90_s17, %s740_s8  ;;  %p745_p10 = scmp.lt.s32.totalorder %s90_s17, %s90_s17 }
  0x70   :  { %p746_p11 = scmp.lt.s32.totalorder %s744_s9, %s740_s8 }
  0x72   :  { %p747_p12 = por %p746_p11, %p745_p10 }
  0x74   :  { %p748_p13 = pnand %p747_p12, %p741_p9 }
  0x76   :  { %751 = shalt.err (!%p748_p13)
}
  0x77   :  { %92 = dma.hbm_to_vmem [thread:$0]  %s969_s6, 16, %s90_s17, [#allocation12]  }
  0x78   :  { %774 = dma.done.wait [#allocation3], 128  }
  0x79   :  { %775 = vsyncadd [#allocation3], 4294967168 }
  0x7a   :  { %776 = dma.done.wait [#allocation6], 528  }
  0x7b   :  { %777 = vsyncadd [#allocation6], 4294966768 }
  0x7c   :  { %778 = dma.done.wait [#allocation9], 2064  }
  0x7d   :  { %779 = vsyncadd [#allocation9], 4294965232 }
  0x7e   :  { %780 = dma.done.wait [#allocation12], 2064  }
  0x7f   :  { %781 = vsyncadd [#allocation12], 4294965232  ;;  %v793_v0 = vmov 0.0|0.0   ;;  %vm794_vm0 = vmmov 0   ;;  %v795_v1 = vmov 0.0   ;;  %v115_v2 = vld [vmem:[#allocation5] sm:$0xff] }
  0x80   :  { %531 = vmatprep.subr.bf16.mxu0 %v793_v0  ;;  %458 = vmatprep.mubr.msk.f32.mxu0 %vm794_vm0, %v795_v1  ;;  %v116_v3 = vld [vmem:[#allocation5 + $0x8] sm:$0xff]  ;;  %v117_v4 = vld [vmem:[#allocation5 + $0x10] sm:$0xff]  ;;  %v118_v6 = vld [vmem:[#allocation5 + $0x18] sm:$0xff]  ;;  %vm126_vm1 = vcmask 261120   ;;  %s796_s6 = smov [#allocation14]  }
  0x81   :  { %537 = vmatprep.subr.bf16.mxu1 %v793_v0  ;;  %493 = vmatprep.mubr.msk.f32.mxu1 %vm794_vm0, %v795_v1  ;;  %v532_v5 = vpack.c.bf16 %v116_v3, %v115_v2  ;;  %v201_v7 = vld [vmem:[#allocation8] sm:$0xff]  ;;  %v202_v8 = vld [vmem:[#allocation8 + $0x8] sm:$0xff]  ;;  %v203_v9 = vld [vmem:[#allocation8 + $0x10] sm:$0xff]  ;;  %v535_v11 = vpack.c.bf16 %v118_v6, %v117_v4  ;;  %s395_s13 = sshll.u32 %s796_s6, 4  ;;  %s396_s13 = int_to_ptr.vmem [resolvable:$true] %s395_s13 }
  0x82   :  { %v204_v10 = vld [vmem:[#allocation8 + $0x18] sm:$0xff]  ;;  %v538_v12 = vpack.c.bf16 %v202_v8, %v201_v7  ;;  %v205_v14 = vld [vmem:[#allocation8 + $0x20] sm:$0xff]  ;;  %v206_v15 = vld [vmem:[#allocation8 + $0x28] sm:$0xff]  ;;  %s752_s0 = scalar_lea.vmem %s396_s13, 128  ;;  %p757_p1 = scmp.lt.s32.totalorder %s396_s13, %s396_s13 }
  0x83   :  { %533 = vmatpush3.bf16.msra.mxu0 %v532_v5  ;;  %v541_v13 = vpack.c.bf16 %v204_v10, %v203_v9  ;;  %v114_v16 = vld [vmem:[#allocation2] sm:$0xff]  ;;  %v544_v17 = vpack.c.bf16 %v206_v15, %v205_v14  ;;  %v209_v21 = vld [vmem:[#allocation8 + $0x40] sm:$0xff]  ;;  %v210_v22 = vld [vmem:[#allocation8 + $0x48] sm:$0xff]  ;;  %p753_p0 = scmp.ne.s32.totalorder %s396_s13, %s752_s0  ;;  %p758_p2 = scmp.lt.s32.totalorder %s752_s0, %s752_s0 }
  0x84   :  { %534 = vmatprep.subr.bf16.mxu0 %v793_v0  ;;  %539 = vmatpush3.bf16.msra.mxu1 %v538_v12  ;;  %v207_v18 = vld [vmem:[#allocation8 + $0x30] sm:$0xff]  ;;  %v208_v19 = vld [vmem:[#allocation8 + $0x38] sm:$0xff]  ;;  %v550_v23 = vpack.c.bf16 %v210_v22, %v209_v21  ;;  %v213_v27 = vld [vmem:[#allocation8 + $0x60] sm:$0xff] }
  0x85   :  { %540 = vmatprep.subr.bf16.mxu1 %v793_v0  ;;  %v547_v20 = vpack.c.bf16 %v208_v19, %v207_v18  ;;  %v211_v24 = vld [vmem:[#allocation8 + $0x50] sm:$0xff]  ;;  %v212_v25 = vld [vmem:[#allocation8 + $0x58] sm:$0xff]  ;;  %v214_v28 = vld [vmem:[#allocation8 + $0x68] sm:$0xff]  ;;  %p759_p3 = por %p758_p2, %p757_p1 }
  0x86   :  { %v553_v26 = vpack.c.bf16 %v212_v25, %v211_v24  ;;  %v556_v29 = vpack.c.bf16 %v214_v28, %v213_v27  ;;  %v215_v30 = vld [vmem:[#allocation8 + $0x70] sm:$0xff]  ;;  %v216_v31 = vld [vmem:[#allocation8 + $0x78] sm:$0xff]  ;;  %v295_v33 = vld [vmem:[#allocation11] sm:$0xff] }
  0x87   :  { %536 = vmatpush3.bf16.msra.mxu0 %v535_v11  ;;  %v559_v32 = vpack.c.bf16 %v216_v31, %v215_v30  ;;  %v296_v34 = vld [vmem:[#allocation11 + $0x8] sm:$0xff]  ;;  %v297_v35 = vld [vmem:[#allocation11 + $0x10] sm:$0xff]  ;;  %v298_v37 = vld [vmem:[#allocation11 + $0x18] sm:$0xff]  ;;  %p760_p4 = pnand %p759_p3, %p753_p0 }
  0x88   :  { %561 = vmatprep.subr.bf16.mxu0 %v793_v0  ;;  %542 = vmatpush3.bf16.msra.mxu1 %v541_v13  ;;  %v562_v36 = vpack.c.bf16 %v296_v34, %v295_v33  ;;  %v565_v38 = vpack.c.bf16 %v298_v37, %v297_v35  ;;  %v299_v39 = vld [vmem:[#allocation11 + $0x20] sm:$0xff]  ;;  %v300_v40 = vld [vmem:[#allocation11 + $0x28] sm:$0xff]  ;;  %v301_v42 = vld [vmem:[#allocation11 + $0x30] sm:$0xff] }
  0x89   :  { %543 = vmatprep.subr.bf16.mxu1 %v793_v0  ;;  %v568_v41 = vpack.c.bf16 %v300_v40, %v299_v39  ;;  %v302_v43 = vld [vmem:[#allocation11 + $0x38] sm:$0xff]  ;;  %v303_v45 = vld [vmem:[#allocation11 + $0x40] sm:$0xff]  ;;  %v304_v46 = vld [vmem:[#allocation11 + $0x48] sm:$0xff] }
  0x8a   :  { %459 = vmatmul.mubr.msk.f32.vlgmr.msra.gmra.mrb[0].mxu0 %vm126_vm1, %v114_v16  ;;  %v571_v44 = vpack.c.bf16 %v302_v43, %v301_v42  ;;  %v574_v47 = vpack.c.bf16 %v304_v46, %v303_v45  ;;  %v305_v48 = vld [vmem:[#allocation11 + $0x50] sm:$0xff]  ;;  %v306_v49 = vld [vmem:[#allocation11 + $0x58] sm:$0xff]  ;;  %v307_v51 = vld [vmem:[#allocation11 + $0x60] sm:$0xff] }
  0x8b   :  { %528 = vmatprep.mubr.msk.f32.mxu0 %vm794_vm0, %v795_v1  ;;  %563 = vmatpush3.bf16.msra.mxu0 %v562_v36  ;;  %v577_v50 = vpack.c.bf16 %v306_v49, %v305_v48  ;;  %v308_v52 = vld [vmem:[#allocation11 + $0x68] sm:$0xff]  ;;  %v407_v54 = vld [vmem:[#allocation7] ss:$0 sm:$0xff]  ;;  %v309_v59 = vld [vmem:[#allocation11 + $0x70] sm:$0xff] }
  0x8c   :  { %545 = vmatpush3.bf16.msra.mxu1 %v544_v17  ;;  %564 = vmatprep.subr.bf16.mxu0 %v793_v0  ;;  %v580_v53 = vpack.c.bf16 %v308_v52, %v307_v51  ;;  %v310_v60 = vld [vmem:[#allocation11 + $0x78] sm:$0xff]  ;;  %v410_v4 = vld [vmem:[#allocation13] ss:$0 sm:$0xff] }
  0x8d   :  { %546 = vmatprep.subr.bf16.mxu1 %v793_v0  ;;  %v583_v61 = vpack.c.bf16 %v310_v60, %v309_v59  ;;  %v409_v62 = vld [vmem:[#allocation10] ss:$0 sm:$0xff] }
  0x8f   :  { %566 = vmatpush3.bf16.msra.mxu0 %v565_v38 }
  0x90   :  { %548 = vmatpush3.bf16.msra.mxu1 %v547_v20  ;;  %567 = vmatprep.subr.bf16.mxu0 %v793_v0 }
  0x91   :  { %549 = vmatprep.subr.bf16.mxu1 %v793_v0 }
  0x93   :  { %569 = vmatpush3.bf16.msra.mxu0 %v568_v41 }
  0x94   :  { %551 = vmatpush3.bf16.msra.mxu1 %v550_v23  ;;  %570 = vmatprep.subr.bf16.mxu0 %v793_v0 }
  0x95   :  { %552 = vmatprep.subr.bf16.mxu1 %v793_v0 }
  0x97   :  { %572 = vmatpush3.bf16.msra.mxu0 %v571_v44 }
  0x98   :  { %554 = vmatpush3.bf16.msra.mxu1 %v553_v26  ;;  %573 = vmatprep.subr.bf16.mxu0 %v793_v0 }
  0x99   :  { %555 = vmatprep.subr.bf16.mxu1 %v793_v0 }
  0x9b   :  { %575 = vmatpush3.bf16.msra.mxu0 %v574_v47 }
  0x9c   :  { %557 = vmatpush3.bf16.msra.mxu1 %v556_v29  ;;  %576 = vmatprep.subr.bf16.mxu0 %v793_v0 }
  0x9d   :  { %558 = vmatprep.subr.bf16.mxu1 %v793_v0 }
  0x9f   :  { %578 = vmatpush3.bf16.msra.mxu0 %v577_v50 }
  0xa0   :  { %560 = vmatpush3.bf16.msra.mxu1 %v559_v32  ;;  %579 = vmatprep.subr.bf16.mxu0 %v793_v0 }
  0xa3   :  { %581 = vmatpush3.bf16.msra.mxu0 %v580_v53 }
  0xa4   :  { %582 = vmatprep.subr.bf16.mxu0 %v793_v0 }
  0xa7   :  { %584 = vmatpush3.bf16.msra.mxu0 %v583_v61 }
 0x15d   :  { %v196_v55 = vpop.f32.mrb[0].mxu0 }
 0x15e   :  { %v197_v56 = vadd.f32 %v407_v54, %v196_v55  ;;  %v460_v57 = vpop.f32.mrb[1].mxu0 }
 0x160   :  { %v200_v58 = vmax.f32 %v197_v56, 0.0 }
 0x162   :  { %494 = vmatmul.mubr.f32.vlgmr.msra.gmra.mrb[0].mxu1 %v200_v58 }
 0x235   :  { %v290_v63 = vpop.f32.mrb[0].mxu1 }
 0x236   :  { %v291_v1 = vadd.f32 %v409_v62, %v290_v63  ;;  %v495_v2 = vpop.f32.mrb[1].mxu1 }
 0x238   :  { %v294_v3 = vmax.f32 %v291_v1, 0.0 }
 0x23a   :  { %529 = vmatmul.mubr.f32.vlgmr.msra.gmra.mrb[2].mxu0 %v294_v3 }
 0x30d   :  { %v384_v0 = vpop.f32.mrb[2].mxu0 }
 0x30e   :  { %v385_v5 = vadd.f32 %v410_v4, %v384_v0  ;;  %v530_v6 = vpop.f32.mrb[3].mxu0 }
 0x310   :  { %388 = vst [vmem:[#allocation14] sm:$0xff] %v385_v5 }
 0x311   :  { %763 = shalt.err (!%p760_p4)
}
 0x312   :  { %s764_s15 = scalar_lea.hbm %s970_s7, 128 }
 0x313   :  { %p765_p5 = scmp.ne.s32.totalorder %s970_s7, %s764_s15  ;;  %p768_p6 = scmp.lt.u32.totalorder %s764_s15, %s970_s7 }
 0x315   :  { %p770_p7 = pnand %p768_p6, %p765_p5 }
 0x317   :  { %773 = shalt.err (!%p770_p7)
}
 0x318   :  { %398 = dma.vmem_to_hbm [thread:$0]  %s396_s13, 128, %s970_s7, [#allocation4]  }
 0x319   :  { %782 = dma.done.wait [#allocation4], 128  }
 0x31a   :  { %783 = vsyncadd [#allocation4], 4294967168 }
 0x31b   :  { %402 = vsyncpa [#allocation3], 1 }
 0x31c   :  { %403 = vsyncpa [#allocation6], 1 }
 0x31d   :  { %404 = vsyncpa [#allocation9], 1 }
 0x31e   :  { %405 = vsyncpa [#allocation12], 1 }
 0x31f   :  { %406 = vsyncpa [#allocation4], 1 }

</bundles_post_ra>
